<compile_context>
chip_gen: v6e
topology: v6e:2x2x1
jax: 0.10.0
libtpu: 0.0.40
codegen_flags: <defaults>
</compile_context>

<pallas_src>
import jax
import jax.numpy as jnp
from jax import lax
from jax.experimental import pallas as pl
from jax.experimental.pallas import tpu as pltpu


def mask_kernel(mask_ref, spec_ref, out_ref):
    # Blocks per grid step: (1, 6, tF, T), (1, 2, tF, T) -> (1, 2, tF, T).
    m0 = mask_ref[0, 0].astype(jnp.float32)
    m1 = mask_ref[0, 1].astype(jnp.float32)
    m2 = mask_ref[0, 2].astype(jnp.float32)
    m3 = mask_ref[0, 3].astype(jnp.float32)
    m4 = mask_ref[0, 4].astype(jnp.float32)
    m5 = mask_ref[0, 5].astype(jnp.float32)
    sr = spec_ref[0, 0].astype(jnp.float32)
    si = spec_ref[0, 1].astype(jnp.float32)

    tF, T = sr.shape  # static block shape; T == full (padded) time axis

    # mag = torch.norm(spec, dim=1)
    mag = jnp.sqrt(sr * sr + si * si)

    # nn.Unfold(kernel_size=(1,3), padding=(0,1)) along T => shifted copies of
    # mag with zero padding, weighted by the 3 deep-filter taps.  Rolls land on
    # the XLU slot; T is un-tiled so the halo never crosses a block boundary.
    t_idx = lax.broadcasted_iota(jnp.int32, (tF, T), 1)
    # mag[f, t-1] with zero at t==0: cyclic roll by +1, mask first column.
    mag_left = jnp.where(t_idx >= 1, pltpu.roll(mag, 1, axis=1), 0.0)
    # mag[f, t+1] with zero at t==T-1: cyclic roll by -1 == roll by +(T-1)
    # (pltpu.roll requires a non-negative shift), mask last column.
    mag_right = jnp.where(t_idx <= T - 2, pltpu.roll(mag, T - 1, axis=1), 0.0)
    x = m0 * mag_left + m1 * mag + m2 * mag_right

    # magnitude mask
    s2mag = jax.nn.sigmoid(m3)

    # Reference: angle = atan2(si, sr+1e-8), s2angle = atan2(m5, m4+1e-8),
    # then cos/sin(angle + s2angle).  Equivalent complex-rotation identity:
    #   cos(a+b) = (ar*br - ai*bi) / (|a|*|b|)
    #   sin(a+b) = (ai*br + ar*bi) / (|a|*|b|)
    # Two EUP rsqrts (idle slot -> free) instead of rsqrt(q1*q2) so that the
    # product cannot overflow/underflow f32.
    ar = sr + 1e-8
    ai = si
    br = m4 + 1e-8
    bi = m5
    q1 = ar * ar + ai * ai
    q2 = br * br + bi * bi
    inv = lax.rsqrt(jnp.maximum(q1, 1e-30)) * lax.rsqrt(jnp.maximum(q2, 1e-30))
    cos_sum = (ar * br - ai * bi) * inv
    sin_sum = (ai * br + ar * bi) * inv

    scale = x * s2mag
    out_ref[0, 0] = (scale * cos_sum).astype(out_ref.dtype)
    out_ref[0, 1] = (scale * sin_sum).astype(out_ref.dtype)


def _choose_f_tile(F, T, itemsize, align, batch):
    """Pick an F tile.

    F is already padded to a multiple of `align`.  The tile is the largest
    divisor of F that is a multiple of `align` and keeps the single-buffered
    12-channel step footprint under ~6 MiB (double-buffered ~12 MiB plus
    temporaries stays under the 32 MiB vmem limit we request).  If possible,
    keep at least 2 total grid steps so megacore sharding has work for both
    TensorCores.
    """
    budget = 6 * 1024 * 1024
    max_tf = budget // (12 * T * itemsize)
    max_tf = max(align, (max_tf // align) * align)

    tf = align
    for k in range(1, F // align + 1):
        cand = k * align
        if F % cand == 0 and cand <= max_tf:
            tf = cand

    # Prefer >=2 grid steps total (megacore) when F can be split further.
    if batch * (F // tf) < 2 and tf > align:
        for k in range(F // align, 0, -1):
            cand = k * align
            if F % cand == 0 and F // cand >= 2:
                tf = cand
                break
    return tf


def mask_forward(mask, spec):
    B, Cm, F, T = mask.shape
    assert Cm == 6, "mask must have 6 channels"
    assert spec.shape == (B, 2, F, T), "spec must be [B, 2, F, T]"

    out_dtype = spec.dtype
    itemsize = max(jnp.dtype(mask.dtype).itemsize, jnp.dtype(spec.dtype).itemsize)
    # Sublane alignment for the second-to-last dim (8 for 32-bit, 16 for bf16).
    align = 8 if itemsize >= 4 else (16 if itemsize == 2 else 32)

    # Pad T to a lane-dense multiple of 128 (unmasked stores) and F to the
    # sublane alignment.  Zero padding is semantics-preserving here: padded
    # spec rows/cols produce mag == 0, matching Unfold's own zero padding at
    # the original T boundary, and the padded region is sliced off below.
    Tp = ((T + 127) // 128) * 128
    Fp = ((F + align - 1) // align) * align
    pad_f, pad_t = Fp - F, Tp - T
    if pad_f or pad_t:
        mask_p = jnp.pad(mask, ((0, 0), (0, 0), (0, pad_f), (0, pad_t)))
        spec_p = jnp.pad(spec, ((0, 0), (0, 0), (0, pad_f), (0, pad_t)))
    else:
        mask_p, spec_p = mask, spec

    tF = _choose_f_tile(Fp, Tp, itemsize, align, B)
    grid = (B, Fp // tF)

    out = pl.pallas_call(
        mask_kernel,
        out_shape=jax.ShapeDtypeStruct((B, 2, Fp, Tp), out_dtype),
        grid=grid,
        in_specs=[
            pl.BlockSpec((1, 6, tF, Tp), lambda b, f: (b, 0, f, 0)),
            pl.BlockSpec((1, 2, tF, Tp), lambda b, f: (b, 0, f, 0)),
        ],
        out_specs=pl.BlockSpec((1, 2, tF, Tp), lambda b, f: (b, 0, f, 0)),
        compiler_params=pltpu.CompilerParams(
            dimension_semantics=("parallel", "parallel"),
            vmem_limit_bytes=32 * 1024 * 1024,
        ),
    )(mask_p, spec_p)

    if pad_f or pad_t:
        out = out[:, :, :F, :T]
    return out


def mask_reference(mask, spec):
    """Pure-JAX transcription of the PyTorch forward (correctness check)."""
    mask_s1 = mask[:, :3]
    s2mag = jax.nn.sigmoid(mask[:, 3])
    s2ang = jnp.arctan2(mask[:, 5], mask[:, 4] + 1e-8)
    mag = jnp.sqrt(jnp.sum(spec ** 2, axis=1, keepdims=True))  # [B,1,F,T]
    angle = jnp.arctan2(spec[:, -1], spec[:, 0] + 1e-8)
    T = spec.shape[3]
    padded = jnp.pad(mag, ((0, 0), (0, 0), (0, 0), (1, 1)))  # zero pad along T
    mag_unfold = jnp.stack([padded[:, 0, :, k:k + T] for k in range(3)], axis=1)
    x = jnp.sum(mag_unfold * mask_s1, axis=1)
    real = x * s2mag * jnp.cos(angle + s2ang)
    imag = x * s2mag * jnp.sin(angle + s2ang)
    return jnp.stack([real, imag], axis=1)


if __name__ == "__main__":
    key = jax.random.PRNGKey(0)

    # Case 1: lane-dense shape (T multiple of 128, F multiple of 8) -> no pad.
    B, F, T = 2, 64, 128
    k1, k2, k3, k4 = jax.random.split(key, 4)
    mask_in = jax.random.normal(k1, (B, 6, F, T), dtype=jnp.float32)
    spec_in = jax.random.normal(k2, (B, 2, F, T), dtype=jnp.float32)
    out = jax.block_until_ready(mask_forward(mask_in, spec_in))
    ref = mask_reference(mask_in, spec_in)
    assert out.shape == (B, 2, F, T)
    assert jnp.allclose(out, ref, atol=1e-4, rtol=1e-4), "mismatch vs reference (case 1)"

    # Case 2: ragged shape exercising the F/T padding path.
    B2, F2, T2 = 2, 65, 100
    mask_in2 = jax.random.normal(k3, (B2, 6, F2, T2), dtype=jnp.float32)
    spec_in2 = jax.random.normal(k4, (B2, 2, F2, T2), dtype=jnp.float32)
    out2 = jax.block_until_ready(mask_forward(mask_in2, spec_in2))
    ref2 = mask_reference(mask_in2, spec_in2)
    assert out2.shape == (B2, 2, F2, T2)
    assert jnp.allclose(out2, ref2, atol=1e-4, rtol=1e-4), "mismatch vs reference (case 2)"

    print("KERNEL_OK")
</pallas_src>

<mosaic_0001>
module attributes {stable_mosaic.version = 11 : i64} {
  func.func @mask_kernel(%arg0: i32, %arg1: i32, %arg2: memref<1x6x64x128xf32, #tpu.memory_space<vmem>>, %arg3: memref<1x2x64x128xf32, #tpu.memory_space<vmem>>, %arg4: memref<1x2x64x128xf32, #tpu.memory_space<vmem>>) attributes {dimension_semantics = [#tpu.dimension_semantics<parallel>, #tpu.dimension_semantics<parallel>], iteration_bounds = array<i64: 2, 1>, scalar_prefetch = 0 : i64, scratch_operands = 0 : i64, tpu.core_type = #tpu.core_type<tc>, window_params = [{transform_indices = @transform_0, window_bounds = array<i64: 1, 6, 64, 128>}, {transform_indices = @transform_1, window_bounds = array<i64: 1, 2, 64, 128>}, {transform_indices = @transform_2, window_bounds = array<i64: 1, 2, 64, 128>}]} {
    %c0 = arith.constant 0 : index
    %c0_0 = arith.constant 0 : index
    %c0_1 = arith.constant 0 : index
    %c0_2 = arith.constant 0 : index
    %0 = vector.load %arg2[%c0, %c0_0, %c0_1, %c0_2] : memref<1x6x64x128xf32, #tpu.memory_space<vmem>>, vector<1x1x64x128xf32>
    %1 = vector.shape_cast %0 : vector<1x1x64x128xf32> to vector<64x128xf32>
    %c0_3 = arith.constant 0 : index
    %c1 = arith.constant 1 : index
    %c0_4 = arith.constant 0 : index
    %c0_5 = arith.constant 0 : index
    %2 = vector.load %arg2[%c0_3, %c1, %c0_4, %c0_5] : memref<1x6x64x128xf32, #tpu.memory_space<vmem>>, vector<1x1x64x128xf32>
    %3 = vector.shape_cast %2 : vector<1x1x64x128xf32> to vector<64x128xf32>
    %c0_6 = arith.constant 0 : index
    %c2 = arith.constant 2 : index
    %c0_7 = arith.constant 0 : index
    %c0_8 = arith.constant 0 : index
    %4 = vector.load %arg2[%c0_6, %c2, %c0_7, %c0_8] : memref<1x6x64x128xf32, #tpu.memory_space<vmem>>, vector<1x1x64x128xf32>
    %5 = vector.shape_cast %4 : vector<1x1x64x128xf32> to vector<64x128xf32>
    %c0_9 = arith.constant 0 : index
    %c3 = arith.constant 3 : index
    %c0_10 = arith.constant 0 : index
    %c0_11 = arith.constant 0 : index
    %6 = vector.load %arg2[%c0_9, %c3, %c0_10, %c0_11] : memref<1x6x64x128xf32, #tpu.memory_space<vmem>>, vector<1x1x64x128xf32>
    %7 = vector.shape_cast %6 : vector<1x1x64x128xf32> to vector<64x128xf32>
    %c0_12 = arith.constant 0 : index
    %c4 = arith.constant 4 : index
    %c0_13 = arith.constant 0 : index
    %c0_14 = arith.constant 0 : index
    %8 = vector.load %arg2[%c0_12, %c4, %c0_13, %c0_14] : memref<1x6x64x128xf32, #tpu.memory_space<vmem>>, vector<1x1x64x128xf32>
    %9 = vector.shape_cast %8 : vector<1x1x64x128xf32> to vector<64x128xf32>
    %c0_15 = arith.constant 0 : index
    %c5 = arith.constant 5 : index
    %c0_16 = arith.constant 0 : index
    %c0_17 = arith.constant 0 : index
    %10 = vector.load %arg2[%c0_15, %c5, %c0_16, %c0_17] : memref<1x6x64x128xf32, #tpu.memory_space<vmem>>, vector<1x1x64x128xf32>
    %11 = vector.shape_cast %10 : vector<1x1x64x128xf32> to vector<64x128xf32>
    %c0_18 = arith.constant 0 : index
    %c0_19 = arith.constant 0 : index
    %c0_20 = arith.constant 0 : index
    %c0_21 = arith.constant 0 : index
    %12 = vector.load %arg3[%c0_18, %c0_19, %c0_20, %c0_21] : memref<1x2x64x128xf32, #tpu.memory_space<vmem>>, vector<1x1x64x128xf32>
    %13 = vector.shape_cast %12 : vector<1x1x64x128xf32> to vector<64x128xf32>
    %c0_22 = arith.constant 0 : index
    %c1_23 = arith.constant 1 : index
    %c0_24 = arith.constant 0 : index
    %c0_25 = arith.constant 0 : index
    %14 = vector.load %arg3[%c0_22, %c1_23, %c0_24, %c0_25] : memref<1x2x64x128xf32, #tpu.memory_space<vmem>>, vector<1x1x64x128xf32>
    %15 = vector.shape_cast %14 : vector<1x1x64x128xf32> to vector<64x128xf32>
    %16 = arith.mulf %13, %13 : vector<64x128xf32>
    %17 = arith.mulf %15, %15 : vector<64x128xf32>
    %18 = arith.addf %16, %17 : vector<64x128xf32>
    %19 = math.sqrt %18 : vector<64x128xf32>
    %20 = tpu.iota {dimensions = array<i32: 1>} : vector<64x128xi32>
    %c1_i32 = arith.constant 1 : i32
    %21 = vector.broadcast %c1_i32 : i32 to vector<64x128xi32>
    %22 = arith.cmpi sge, %20, %21 : vector<64x128xi32>
    %c1_i32_26 = arith.constant 1 : i32
    %23 = tpu.dynamic_rotate %19 by %c1_i32_26 dim 1 : vector<64x128xf32>, i32 -> vector<64x128xf32>
    %cst = arith.constant 0.000000e+00 : f32
    %24 = vector.broadcast %cst : f32 to vector<64x128xf32>
    %25 = arith.select %22, %23, %24 : vector<64x128xi1>, vector<64x128xf32>
    %c126_i32 = arith.constant 126 : i32
    %26 = vector.broadcast %c126_i32 : i32 to vector<64x128xi32>
    %27 = arith.cmpi sle, %20, %26 : vector<64x128xi32>
    %c127_i32 = arith.constant 127 : i32
    %28 = tpu.dynamic_rotate %19 by %c127_i32 dim 1 : vector<64x128xf32>, i32 -> vector<64x128xf32>
    %cst_27 = arith.constant 0.000000e+00 : f32
    %29 = vector.broadcast %cst_27 : f32 to vector<64x128xf32>
    %30 = arith.select %27, %28, %29 : vector<64x128xi1>, vector<64x128xf32>
    %31 = arith.mulf %1, %25 : vector<64x128xf32>
    %32 = arith.mulf %3, %19 : vector<64x128xf32>
    %33 = arith.addf %31, %32 : vector<64x128xf32>
    %34 = arith.mulf %5, %30 : vector<64x128xf32>
    %35 = arith.addf %33, %34 : vector<64x128xf32>
    %36 = arith.negf %7 : vector<64x128xf32>
    %37 = math.exp %36 : vector<64x128xf32>
    %cst_28 = arith.constant 1.000000e+00 : f32
    %38 = vector.broadcast %cst_28 : f32 to vector<64x128xf32>
    %39 = arith.addf %38, %37 : vector<64x128xf32>
    %40 = arith.divf %38, %39 : vector<64x128xf32>
    %cst_29 = arith.constant 9.99999993E-9 : f32
    %41 = vector.broadcast %cst_29 : f32 to vector<64x128xf32>
    %42 = arith.addf %13, %41 : vector<64x128xf32>
    %cst_30 = arith.constant 9.99999993E-9 : f32
    %43 = vector.broadcast %cst_30 : f32 to vector<64x128xf32>
    %44 = arith.addf %9, %43 : vector<64x128xf32>
    %45 = arith.mulf %42, %42 : vector<64x128xf32>
    %46 = arith.mulf %15, %15 : vector<64x128xf32>
    %47 = arith.addf %45, %46 : vector<64x128xf32>
    %48 = arith.mulf %44, %44 : vector<64x128xf32>
    %49 = arith.mulf %11, %11 : vector<64x128xf32>
    %50 = arith.addf %48, %49 : vector<64x128xf32>
    %cst_31 = arith.constant 1.000000e-30 : f32
    %51 = vector.broadcast %cst_31 : f32 to vector<64x128xf32>
    %52 = arith.maximumf %47, %51 : vector<64x128xf32>
    %53 = math.rsqrt %52 : vector<64x128xf32>
    %cst_32 = arith.constant 1.000000e-30 : f32
    %54 = vector.broadcast %cst_32 : f32 to vector<64x128xf32>
    %55 = arith.maximumf %50, %54 : vector<64x128xf32>
    %56 = math.rsqrt %55 : vector<64x128xf32>
    %57 = arith.mulf %53, %56 : vector<64x128xf32>
    %58 = arith.mulf %42, %44 : vector<64x128xf32>
    %59 = arith.mulf %15, %11 : vector<64x128xf32>
    %60 = arith.subf %58, %59 : vector<64x128xf32>
    %61 = arith.mulf %60, %57 : vector<64x128xf32>
    %62 = arith.mulf %15, %44 : vector<64x128xf32>
    %63 = arith.mulf %42, %11 : vector<64x128xf32>
    %64 = arith.addf %62, %63 : vector<64x128xf32>
    %65 = arith.mulf %64, %57 : vector<64x128xf32>
    %66 = arith.mulf %35, %40 : vector<64x128xf32>
    %67 = arith.mulf %66, %61 : vector<64x128xf32>
    %c0_33 = arith.constant 0 : index
    %c0_34 = arith.constant 0 : index
    %c0_35 = arith.constant 0 : index
    %c0_36 = arith.constant 0 : index
    %68 = vector.load %arg4[%c0_33, %c0_34, %c0_35, %c0_36] : memref<1x2x64x128xf32, #tpu.memory_space<vmem>>, vector<1x1x64x128xf32>
    %69 = vector.shape_cast %68 : vector<1x1x64x128xf32> to vector<64x128xf32>
    %70 = vector.shape_cast %67 : vector<64x128xf32> to vector<1x1x64x128xf32>
    tpu.vector_store %arg4[%c0_33, %c0_34, %c0_35, %c0_36], %70 {strides = array<i32>} : memref<1x2x64x128xf32, #tpu.memory_space<vmem>>, vector<1x1x64x128xf32>,
    %71 = arith.mulf %66, %65 : vector<64x128xf32>
    %c0_37 = arith.constant 0 : index
    %c1_38 = arith.constant 1 : index
    %c0_39 = arith.constant 0 : index
    %c0_40 = arith.constant 0 : index
    %72 = vector.load %arg4[%c0_37, %c1_38, %c0_39, %c0_40] : memref<1x2x64x128xf32, #tpu.memory_space<vmem>>, vector<1x1x64x128xf32>
    %73 = vector.shape_cast %72 : vector<1x1x64x128xf32> to vector<64x128xf32>
    %74 = vector.shape_cast %71 : vector<64x128xf32> to vector<1x1x64x128xf32>
    tpu.vector_store %arg4[%c0_37, %c1_38, %c0_39, %c0_40], %74 {strides = array<i32>} : memref<1x2x64x128xf32, #tpu.memory_space<vmem>>, vector<1x1x64x128xf32>,
    return
  }
  func.func @transform_0(%arg0: i32, %arg1: i32) -> (i32, i32, i32, i32) {
    %c0_i32 = arith.constant 0 : i32
    %c0_i32_0 = arith.constant 0 : i32
    %c0_i32_1 = arith.constant 0 : i32
    return %arg0, %c0_i32, %arg1, %c0_i32_0 : i32, i32, i32, i32
  }
  func.func @transform_1(%arg0: i32, %arg1: i32) -> (i32, i32, i32, i32) {
    %c0_i32 = arith.constant 0 : i32
    %c0_i32_0 = arith.constant 0 : i32
    %c0_i32_1 = arith.constant 0 : i32
    return %arg0, %c0_i32, %arg1, %c0_i32_0 : i32, i32, i32, i32
  }
  func.func @transform_2(%arg0: i32, %arg1: i32) -> (i32, i32, i32, i32) {
    %c0_i32 = arith.constant 0 : i32
    %c0_i32_0 = arith.constant 0 : i32
    %c0_i32_1 = arith.constant 0 : i32
    return %arg0, %c0_i32, %arg1, %c0_i32_0 : i32, i32, i32, i32
  }
}

</mosaic_0001>

<bundles_post_ra>
// kernel: tpu_custom_call.1
= control target key start
LH: loop header
LB: loop body
LE: loop exit
PB: predicated region body
PF: predicated region fallthrough
CT: control target
= control target key end

     0   :  { %7 = vsyncpa [#allocation3], 0  ;;  %s1945_s0 = inlined_call_operand.hbm [shape: f32[2,6,64,128], index: 0, kind: input, shape index: {}]   ;;  %s1946_s1 = inlined_call_operand.hbm [shape: f32[2,2,64,128], index: 1, kind: input, shape index: {}]   ;;  %s1947_s2 = inlined_call_operand.hbm [shape: f32[2,2,64,128], index: 2, kind: output, shape index: {}]  }
   0x1   :  { %9 = vsyncpa [#allocation3 + $0x1], 0 }
   0x2   :  { %10 = vsyncpa [#allocation6], 0 }
   0x3   :  { %12 = vsyncpa [#allocation6 + $0x1], 0 }
   0x4   :  { %13 = vsyncpa [#allocation4], 0 }
   0x5   :  { %15 = vsyncpa [#allocation4 + $0x1], 0  ;;  %s1251_s9 = smov 0   ;;  %s1253_s10 = smov 0  }
   0x6   :  { %s1255_s11 = smov 0   ;;  %s1257_s12 = smov 0  }
   0x7   :  { %s1259_s13 = smov 0   ;;  %s1261_s14 = smov 0  }
   0x8 LB: > { %s847_s15 = sadd.s32 4294967295, %s1225_s14   ;;  %s848_s16 = sadd.s32 4294967294, %s1225_s14   ;;  %s1225_s14 = sphi %s1261_s14, %s21_s14   ;;  %s1221_s13 = sphi %s1259_s13, %s1958_s13   ;;  %s1217_s12 = sphi %s1257_s12, %s1957_s12   ;;  %s1213_s11 = sphi %s1255_s11, %s1956_s11   ;;  %s1209_s10 = sphi %s1253_s10, %s1955_s10   ;;  %s1205_s9 = sphi %s1251_s9, %s1954_s9  }
   0x9   : > { %s33_s17 = sadd.s32 1, %s1221_s13  ;;  %s42_s18 = sadd.s32 1, %s1213_s11 }
   0xa   : > { %p35_p0 = scmp.ge.s32.totalorder %s33_s17, 2  ;;  %p49_p1 = scmp.ne.s32.totalorder %s1213_s11, %s1209_s10 }
   0xb   : > { %p50_p2 = scmp.eq.s32.totalorder %s1225_s14, 0  ;;  %p55_p3 = scmp.ne.s32.totalorder %s1209_s10, %s1205_s9 }
   0xc   : > { %s1960_s17 = smov (%p35_p0, %s33_s17), 0  ;;  %p56_p5 = scmp.eq.s32.totalorder %s847_s15, 0 }
   0xd   : > { %p1292_p4 = por %p50_p2, %p49_p1  ;;  %s37_s20 = ssub.s32 %s1221_s13, %s1960_s17 }
   0xe   : > { %p109_p6 = scmp.eq.s32.totalorder %s847_s15, 1  ;;  %p40_p7 = scmp.eq.s32.totalorder %s37_s20, 0 }
   0xf   : > { %p1298_p8 = por %p56_p5, %p55_p3  ;;  %p115_p10 = scmp.eq.s32.totalorder %s848_s16, 1 }
  0x10   : > { %p1302_p9 = por %p109_p6, %p49_p1  ;;  %p850_p12 = scmp.ge.s32.totalorder %s1225_s14, 2 }
  0x11   : > { %s1307_s23 = scalar_select %p40_p7, %s1213_s11, %s42_s18  }
  0x12   : > { %p1309_p11 = por %p115_p10, %p55_p3  ;;  %p949_p13 = scmp.lt.s32.totalorder %s1225_s14, 2 }
  0x13   : > { %s1316_s25 = sand.u32 1, %s1213_s11   ;;  %s930_s27 = smul.u32 6144, %s1221_s13 }
  0x14   : > { %s929_s26 = smul.u32 384, %s1316_s25  ;;  %p1322_p0 = pnand %p949_p13, %p1292_p4 }
  0x15   : > { %s147_s3 = scalar_lea.hbm %s1945_s0, %s930_s27  ;;  %p855_p1 = scmp.ge.s32.totalorder %s1225_s14, 1 }
  0x16   : > { %s139_s4 = scalar_lea.vmem [#allocation2], %s929_s26  ;;  %s136_s6 = scalar_lea.sflag [#allocation3], %s1316_s25 }
  0x17   : > { %s148_s5 = sshll.u32 %s139_s4, 4  ;;  %p1087_p2 = pneg %p1322_p0  ;;  %s149_s5 = int_to_ptr.vmem [resolvable:$true] %s148_s5 }
  0x18   : > { %s1098_s7 = scalar_lea.vmem %s149_s5, 6144  ;;  %s1227_s8 = smov [#allocation2]  }
  0x19   : > { %p1099_p3 = scmp.ne.s32.totalorder %s149_s5, %s1098_s7  ;;  %s1103_s15 = sshll.u32 %s1227_s8, 4  ;;  %s1104_s15 = int_to_ptr.vmem [resolvable:$false] %s1103_s15 }
  0x1a   : > { %s1105_s16 = scalar_lea.vmem %s1104_s15, 12288  ;;  %p1106_p6 = scmp.lt.s32.totalorder %s149_s5, %s1104_s15 }
  0x1b   : > { %p1101_p4 = pnand %p1099_p3, %p1087_p2  ;;  %p1107_p7 = scmp.lt.s32.totalorder %s1105_s16, %s1098_s7 }
  0x1d   : > { %p1102_p5 = pneg %p1101_p4  ;;  %p1108_p10 = por %p1107_p7, %p1106_p6 }
  0x1f   : > { %p1109_p13 = pnand %p1108_p10, %p1102_p5 }
  0x21   : > { %1112 = shalt.err (!%p1109_p13)
}
  0x22   : > { %s1228_s18 = smov 128   ;;  %s1229_s19 = smov 8  }
  0x23   : > { %941 = dma.hbm_to_vmem [thread:$0]  (!%p1322_p0), %s147_s3, 6144, %s149_s5, %s136_s6, %s1228_s18, %s1228_s18, %s1229_s19  }
  0x24   : > { %p179_p3 = scmp.lt.s32.totalorder %s1225_s14, 3  ;;  %s852_s20 = sshll.u32 %s1316_s25, 7 }
  0x25   : > { %s927_s26 = sshll.u32 %s1221_s13, 11  ;;  %s162_s7 = scalar_lea.vmem [#allocation5], %s852_s20 }
  0x26   : > { %p1343_p4 = pnand %p855_p1, %p179_p3  ;;  %s170_s4 = scalar_lea.hbm %s1946_s1, %s927_s26 }
  0x27   : > { %s171_s8 = sshll.u32 %s162_s7, 4  ;;  %s159_s15 = scalar_lea.sflag [#allocation6], %s1316_s25  ;;  %s172_s8 = int_to_ptr.vmem [resolvable:$true] %s171_s8 }
  0x28   : > { %s1126_s16 = scalar_lea.vmem %s172_s8, 2048  ;;  %s1230_s3 = smov [#allocation5]  }
  0x29   : > { %p1127_p5 = scmp.ne.s32.totalorder %s172_s8, %s1126_s16  ;;  %s1131_s5 = sshll.u32 %s1230_s3, 4  ;;  %s1132_s5 = int_to_ptr.vmem [resolvable:$false] %s1131_s5 }
  0x2a   : > { %s1133_s6 = scalar_lea.vmem %s1132_s5, 4096  ;;  %p1134_p1 = scmp.lt.s32.totalorder %s172_s8, %s1132_s5 }
  0x2b   : > { %p1129_p6 = pnand %p1127_p5, %p1087_p2  ;;  %p1135_p10 = scmp.lt.s32.totalorder %s1133_s6, %s1126_s16 }
  0x2d   : > { %p1130_p7 = pneg %p1129_p6  ;;  %p1136_p13 = por %p1135_p10, %p1134_p1 }
  0x2f   : > { %p1137_p3 = pnand %p1136_p13, %p1130_p7 }
  0x31   : > { %1140 = shalt.err (!%p1137_p3)
}
  0x32   : > { %944 = dma.hbm_to_vmem [thread:$0]  (!%p1322_p0), %s170_s4, 2048, %s172_s8, %s159_s15, %s1228_s18, %s1228_s18, %s1229_s19  }
  0x33   : > { %183 = sbr.rel (%p1343_p4) target bundleno = 251 (0xfb), region = 28  ;;  %s1359_s25 = sand.u32 (!%p1343_p4), 1, %s1209_s10  }
  0x34   : > { %s931_s20 = smul.u32 (!%p1343_p4), 384, %s1359_s25  ;;  %s186_s26 = scalar_lea.sflag (!%p1343_p4), [#allocation3], %s1359_s25 }
  0x36   : > { %s1363_s29 = scalar_lea.vmem (!%p1343_p4), [#allocation2], %s931_s20 }
  0x38   : > { %1192 = dma.done.wait (%p1298_p8), %s186_s26, 6144  }
  0x39   : > { %1194 = vsyncadd (%p1298_p8), %s186_s26, 4294961152  ;;  %s856_s28 = sshll.u32 %s1359_s25, 7  ;;  %s195_s18 = scalar_lea.sflag [#allocation6], %s1359_s25 }
  0x3a   : > { %s1373_s19 = scalar_lea.vmem [#allocation5], %s856_s28 }
  0x3b   : > { %1196 = dma.done.wait (%p1298_p8), %s195_s18, 2048  }
  0x3c   : > { %1198 = vsyncadd (%p1298_p8), %s195_s18, 4294965248  ;;  %v1380_v0 = vld [vmem:[%s1373_s19 + $0x10] sm:$0xff]  ;;  %v280_v4 = vld [vmem:[%s1373_s19] sm:$0xff]  ;;  %s1231_s21 = smov 1   ;;  %s1232_s27 = smov 127  }
  0x3d   : > { %v1383_v1 = vld [vmem:[%s1373_s19 + $0x50] sm:$0xff]  ;;  %v299_v2 = vmul.f32 %v1380_v0, %v1380_v0  ;;  %v1393_v5 = vld [vmem:[%s1373_s19 + $0x40] sm:$0xff]  ;;  %v297_v6 = vmul.f32 %v280_v4, %v280_v4  ;;  %v1400_v8 = vld [vmem:[%s1373_s19 + $0x18] sm:$0xff]  ;;  %v1520_v51 = vadd.f32 1e-08, %v280_v4  ;;  %s1851_s30 = scalar_lea.vmem [#allocation7], %s856_s28 }
  0x3e   : > { %v1389_v3 = vmul.f32 %v1383_v1, %v1383_v1  ;;  %v1397_v7 = vmul.f32 %v1393_v5, %v1393_v5  ;;  %v1403_v9 = vld [vmem:[%s1373_s19 + $0x58] sm:$0xff]  ;;  %v300_v11 = vmul.f32 %v1400_v8, %v1400_v8  ;;  %v281_v13 = vld [vmem:[%s1373_s19 + $0x8] sm:$0xff]  ;;  %v1431_v20 = vld [vmem:[%s1373_s19 + $0x20] sm:$0xff]  ;;  %s928_s4 = sshll.u32 %s1217_s12, 11  ;;  %s734_s7 = sshll.u32 %s1851_s30, 4  ;;  %s1891_s7 = int_to_ptr.vmem [resolvable:$true] %s734_s7 }
  0x3f   : > { %v1412_v12 = vmul.f32 %v1403_v9, %v1403_v9  ;;  %v1416_v14 = vld [vmem:[%s1373_s19 + $0x48] sm:$0xff]  ;;  %v298_v16 = vmul.f32 %v281_v13, %v281_v13  ;;  %v1434_v21 = vld [vmem:[%s1373_s19 + $0x60] sm:$0xff]  ;;  %v1438_v22 = vld [vmem:[%s1373_s19 + $0x38] sm:$0xff]  ;;  %v301_v28 = vmul.f32 %v1431_v20, %v1431_v20  ;;  %v1490_v40 = vadd.f32 1e-08, %v281_v13  ;;  %s1889_s16 = scalar_lea.hbm %s1947_s2, %s928_s4  ;;  %s719_s12 = scalar_lea.sflag [#allocation4], %s1359_s25 }
  0x40   : > { %v1406_v10 = vadd.f32 %v1389_v3, %v299_v2  ;;  %v1419_v15 = vadd.f32 %v1397_v7, %v297_v6  ;;  %v306_v17 = vmul.f32 %v1416_v14, %v1416_v14  ;;  %v1424_v18 = vld [vmem:[%s1373_s19 + $0x28] sm:$0xff]  ;;  %v1441_v23 = vld [vmem:[%s1373_s19 + $0x78] sm:$0xff]  ;;  %v1458_v29 = vmul.f32 %v1434_v21, %v1434_v21  ;;  %v1468_v32 = vld [vmem:[%s1373_s19 + $0x30] sm:$0xff]  ;;  %s1141_s3 = scalar_lea.vmem %s1891_s7, 2048  ;;  %s1233_s5 = smov [#allocation7]  }
  0x41   : > { %v1427_v19 = vld [vmem:[%s1373_s19 + $0x68] sm:$0xff]  ;;  %v1444_v24 = vadd.f32 %v1412_v12, %v300_v11  ;;  %v302_v26 = vmul.f32 %v1424_v18, %v1424_v18  ;;  %v304_v30 = vmul.f32 %v1438_v22, %v1438_v22  ;;  %v1464_v31 = vmul.f32 %v1441_v23, %v1441_v23  ;;  %v1471_v33 = vld [vmem:[%s1373_s19 + $0x70] sm:$0xff]  ;;  %v882_v44 = vld [vmem:[%s1363_s29 + $0x100] sm:$0xff]  ;;  %p1142_p8 = scmp.ne.s32.totalorder %s1891_s7, %s1141_s3  ;;  %s1145_s6 = sshll.u32 %s1233_s5, 4  ;;  %s1146_s6 = int_to_ptr.vmem [resolvable:$false] %s1145_s6 }
  0x42   : > { %1005 = vrsqrt.f32 %v1406_v10  ;;  %v1446_v25 = vadd.f32 %v306_v17, %v298_v16  ;;  %v1452_v27 = vmul.f32 %v1427_v19, %v1427_v19  ;;  %v883_v34 = vld [vmem:[%s1363_s29 + $0x108] sm:$0xff]  ;;  %v1479_v36 = vadd.f32 %v1458_v29, %v301_v28  ;;  %v1523_v52 = vld [vmem:[%s1363_s29 + $0x140] sm:$0xff]  ;;  %s1147_s20 = scalar_lea.vmem %s1146_s6, 4096  ;;  %p1148_p4 = scmp.lt.s32.totalorder %s1891_s7, %s1146_s6 }
  0x43   : > { %1007 = vrsqrt.f32 %v1419_v15  ;;  %v1482_v37 = vadd.f32 %v1464_v31, %v304_v30  ;;  %v303_v38 = vmul.f32 %v1468_v32, %v1468_v32  ;;  %v1488_v39 = vmul.f32 %v1471_v33, %v1471_v33  ;;  %v1502_v43 = vld [vmem:[%s1363_s29 + $0x148] sm:$0xff]  ;;  %p1143_p0 = pnand %p1142_p8, %p1302_p9  ;;  %p1149_p5 = scmp.lt.s32.totalorder %s1147_s20, %s1141_s3 }
  0x44   : > { %1009 = vrsqrt.f32 %v1444_v24  ;;  %v1476_v35 = vadd.f32 %v1452_v27, %v302_v26  ;;  %v1492_v41 = vadd.f32 1e-08, %v883_v34  ;;  %vm337_vm0 = vcmp.eq.f32.partialorder %v1406_v10, inf }
  0x45   : > { %1011 = vrsqrt.f32 %v1446_v25  ;;  %vm339_vm1 = vcmp.eq.f32.partialorder %v1406_v10, 0.0  ;;  %v340_v42 = vand.u32 2147483648, %v1406_v10  ;;  %vm323_vm2 = vcmp.eq.f32.partialorder %v1419_v15, inf  ;;  %p1144_p2 = pneg %p1143_p0  ;;  %p1150_p6 = por %p1149_p5, %p1148_p4 }
  0x46   : > { %1013 = vrsqrt.f32 %v1476_v35  ;;  %vm325_vm3 = vcmp.eq.f32.partialorder %v1419_v15, 0.0  ;;  %v326_v45 = vand.u32 2147483648, %v1419_v15  ;;  %vm344_vm4 = vcmp.eq.f32.partialorder %v1444_v24, inf }
  0x47   : > { %1015 = vrsqrt.f32 %v1479_v36  ;;  %vm346_vm5 = vcmp.eq.f32.partialorder %v1444_v24, 0.0  ;;  %v347_v46 = vand.u32 2147483648, %v1444_v24  ;;  %v1511_v47 = vadd.f32 %v1488_v39, %v303_v38  ;;  %p1151_p7 = pnand %p1150_p6, %p1144_p2 }
  0x48   : > { %1017 = vrsqrt.f32 %v1482_v37  ;;  %v534_v48 = vmul.f32 %v1490_v40, %v1490_v40  ;;  %v550_v49 = vmul.f32 %v1492_v41, %v1492_v41  ;;  %vm330_vm6 = vcmp.eq.f32.partialorder %v1446_v25, inf }
  0x49   : > { %v558_v50 = vmul.f32 %v1502_v43, %v1502_v43  ;;  %v1525_v53 = vadd.f32 1e-08, %v882_v44  ;;  %vm332_vm7 = vcmp.eq.f32.partialorder %v1446_v25, 0.0  ;;  %v333_v55 = vand.u32 2147483648, %v1446_v25 }
  0x4a   : > { %vm358_vm8 = vcmp.eq.f32.partialorder %v1476_v35, inf  ;;  %1019 = vrsqrt.f32 %v1511_v47  ;;  %vm360_vm9 = vcmp.eq.f32.partialorder %v1476_v35, 0.0  ;;  %v542_v58 = vadd.f32 %v534_v48, %v306_v17 }
  0x4b   : > { %v566_v59 = vadd.f32 %v558_v50, %v550_v49  ;;  %v533_v60 = vmul.f32 %v1520_v51, %v1520_v51  ;;  %v361_v62 = vand.u32 2147483648, %v1476_v35  ;;  %v549_v63 = vmul.f32 %v1525_v53, %v1525_v53 }
  0x4c   : > { %v557_v2 = vmul.f32 %v1523_v52, %v1523_v52  ;;  %v574_v6 = vmax.f32 %v542_v58, 1e-30  ;;  %vm351_vm10 = vcmp.eq.f32.partialorder %v1479_v36, inf  ;;  %vm353_vm11 = vcmp.eq.f32.partialorder %v1479_v36, 0.0 }
  0x4d   : > { %v590_v11 = vmax.f32 %v566_v59, 1e-30  ;;  %v541_v13 = vadd.f32 %v533_v60, %v1397_v7  ;;  %v354_v38 = vand.u32 2147483648, %v1479_v36  ;;  %vm372_vm12 = vcmp.eq.f32.partialorder %v1482_v37, inf }
  0x4e   : > { %v565_v28 = vadd.f32 %v557_v2, %v549_v63  ;;  %1021 = vrsqrt.f32 %v574_v6  ;;  %vm374_vm13 = vcmp.eq.f32.partialorder %v1482_v37, 0.0  ;;  %v520_v50 = vadd.f32 1e-08, %v1400_v8 }
  0x4f   : > { %v1006_v54 = vpop.eup %1005  ;;  %1023 = vrsqrt.f32 %v590_v11  ;;  %vm365_vm14 = vcmp.eq.f32.partialorder %v1511_v47, inf  ;;  %v614_v8 = vmul.f32 %v1492_v41, %v1490_v40  ;;  %v646_v60 = vmul.f32 %v1416_v14, %v1492_v41 }
  0x50   : > { %v1008_v56 = vpop.eup %1007  ;;  %v336_v57 = vmul.f32 %v1006_v54, %v1406_v10  ;;  %v589_v44 = vmax.f32 %v565_v28, 1e-30  ;;  %v536_v6 = vmul.f32 %v520_v50, %v520_v50  ;;  %vm367_vm15 = vcmp.eq.f32.partialorder %v1511_v47, 0.0 }
  0x51   : > { %v322_v61 = vmul.f32 %v1008_v56, %v1419_v15  ;;  %v1010_v16 = vpop.eup %1009  ;;  %v653_v28 = vmul.f32 %v1523_v52, %v1520_v51 }
  0x52   : > { %v338_v4 = vsel %vm337_vm0, %v1406_v10, %v336_v57  ;;  %v1012_v30 = vpop.eup %1011  ;;  %v343_v10 = vmul.f32 %v1010_v16, %v1444_v24  ;;  %v621_v16 = vmul.f32 %v1393_v5, %v1523_v52 }
  0x53   : > { %v1547_v17 = vsel %vm339_vm1, %v340_v42, %v338_v4  ;;  %v324_v26 = vsel %vm323_vm2, %v1419_v15, %v322_v61  ;;  %v329_v34 = vmul.f32 %v1012_v30, %v1446_v25  ;;  %v573_v42 = vmax.f32 %v541_v13, 1e-30 }
  0x54   : > { %384 = vrot.lane.b32.xlu1 %v1547_v17, %s1231_s21  ;;  %v1557_v7 = vsel %vm325_vm3, %v326_v45, %v324_v26  ;;  %v345_v15 = vsel %vm344_vm4, %v1444_v24, %v343_v10  ;;  %v1014_v45 = vpop.eup %1013  ;;  %v375_v24 = vand.u32 2147483648, %v1482_v37  ;;  %v654_v61 = vmul.f32 %v1502_v43, %v1490_v40  ;;  %v893_v10 = vld [vmem:[%s1363_s29 + $0x158] sm:$0xff] }
  0x55   : > { %380 = vrot.lane.b32.xlu0 %v1557_v7, %s1231_s21  ;;  %v1572_v48 = vsel %vm346_vm5, %v347_v46, %v345_v15  ;;  %v331_v49 = vsel %vm330_vm6, %v1446_v25, %v329_v34  ;;  %1025 = vrsqrt.f32 %v573_v42  ;;  %v1016_v54 = vpop.eup %1015  ;;  %v357_v57 = vmul.f32 %v1014_v45, %v1476_v35  ;;  %v884_v45 = vld [vmem:[%s1363_s29 + $0x110] sm:$0xff] }
  0x56   : > { %v1582_v56 = vsel %vm332_vm7, %v333_v55, %v331_v49  ;;  %1027 = vrsqrt.f32 %v589_v44  ;;  %v1018_v46 = vpop.eup %1017  ;;  %v350_v58 = vmul.f32 %v1016_v54, %v1479_v36  ;;  %v622_v25 = vmul.f32 %v1416_v14, %v1502_v43 }
  0x57   : > { %v359_v55 = vsel %vm358_vm8, %v1476_v35, %v357_v57  ;;  %v371_v59 = vmul.f32 %v1018_v46, %v1482_v37  ;;  %v1020_v11 = vpop.eup %1019  ;;  %v368_v40 = vand.u32 2147483648, %v1511_v47  ;;  %v662_v41 = vadd.f32 %v654_v61, %v646_v60 }
  0x58   : > { %386 = vrot.lane.b32.xlu1 %v1572_v48, %s1231_s21  ;;  %v1604_v63 = vsel %vm360_vm9, %v361_v62, %v359_v55  ;;  %v352_v2 = vsel %vm351_vm10, %v1479_v36, %v350_v58  ;;  %v630_v4 = vsub.f32 %v614_v8, %v622_v25  ;;  %v364_v62 = vmul.f32 %v1020_v11, %v1511_v47  ;;  %v885_v36 = vld [vmem:[%s1363_s29 + $0x118] sm:$0xff]  ;;  %v892_v25 = vld [vmem:[%s1363_s29 + $0x150] sm:$0xff] }
  0x59   : > { %382 = vrot.lane.b32.xlu0 %v1582_v56, %s1231_s21  ;;  %v1613_v14 = vsel %vm353_vm11, %v354_v38, %v352_v2  ;;  %v373_v35 = vsel %vm372_vm12, %v1482_v37, %v371_v59  ;;  %v613_v13 = vmul.f32 %v1525_v53, %v1520_v51  ;;  %v645_v26 = vmul.f32 %v1393_v5, %v1525_v53 }
  0x5a   : > { %v1623_v43 = vsel %vm374_vm13, %v375_v24, %v373_v35  ;;  %v366_v37 = vsel %vm365_vm14, %v1511_v47, %v364_v62  ;;  %v544_v30 = vadd.f32 %v536_v6, %v1412_v12  ;;  %v528_v42 = vadd.f32 1e-08, %v885_v36  ;;  %v895_v62 = vld [vmem:[%s1363_s29 + $0x168] sm:$0xff] }
  0x5b   : > { %v1643_v34 = vsel %vm367_vm15, %v368_v40, %v366_v37  ;;  %v629_v38 = vsub.f32 %v613_v13, %v621_v16  ;;  %v1022_v15 = vpop.eup %1021  ;;  %v661_v5 = vadd.f32 %v653_v28, %v645_v26  ;;  %v560_v52 = vmul.f32 %v893_v10, %v893_v10  ;;  %v887_v13 = vld [vmem:[%s1363_s29 + $0x128] sm:$0xff] }
  0x5c   : > { %390 = vrot.lane.b32.xlu1 %v1604_v63, %s1231_s21  ;;  %v576_v47 = vmax.f32 %v544_v30, 1e-30  ;;  %v1024_v53 = vpop.eup %1023  ;;  %v552_v51 = vmul.f32 %v528_v42, %v528_v42  ;;  %v1647_v44 = vmul.f32 %v528_v42, %v520_v50  ;;  %v1650_v12 = vmul.f32 %v1403_v9, %v893_v10 }
  0x5d   : > { %388 = vrot.lane.b32.xlu0 %v1613_v14, %s1231_s21  ;;  %v606_v49 = vmul.f32 %v1024_v53, %v1022_v15  ;;  %v648_v54 = vmul.f32 %v1403_v9, %v528_v42  ;;  %v656_v57 = vmul.f32 %v893_v10, %v520_v50  ;;  %v519_v8 = vadd.f32 1e-08, %v1380_v0 }
  0x5e   : > { %v568_v46 = vadd.f32 %v560_v52, %v552_v51  ;;  %v632_v58 = vsub.f32 %v1647_v44, %v1650_v12  ;;  %v527_v60 = vadd.f32 1e-08, %v884_v45  ;;  %1029 = vrsqrt.f32 %v576_v47  ;;  %v886_v45 = vld [vmem:[%s1363_s29 + $0x120] sm:$0xff] }
  0x5f   : > { %v1662_v59 = vmul.f32 %v630_v4, %v606_v49  ;;  %v1664_v9 = vmul.f32 %v662_v41, %v606_v49  ;;  %v1666_v50 = vadd.f32 %v656_v57, %v648_v54  ;;  %v535_v6 = vmul.f32 %v519_v8, %v519_v8  ;;  %v894_v57 = vld [vmem:[%s1363_s29 + $0x160] sm:$0xff] }
  0x60   : > { %394 = vrot.lane.b32.xlu1 %v1623_v43, %s1231_s21  ;;  %v592_v2 = vmax.f32 %v568_v46, 1e-30  ;;  %v551_v11 = vmul.f32 %v527_v60, %v527_v60  ;;  %v559_v0 = vmul.f32 %v892_v25, %v892_v25  ;;  %v1668_v35 = vmul.f32 %v527_v60, %v519_v8 }
  0x61   : > { %392 = vrot.lane.b32.xlu0 %v1643_v34, %s1231_s21  ;;  %v1671_v40 = vmul.f32 %v1383_v1, %v892_v25  ;;  %v543_v36 = vadd.f32 %v535_v6, %v1389_v3  ;;  %v647_v37 = vmul.f32 %v1383_v1, %v527_v60  ;;  %v655_v28 = vmul.f32 %v892_v25, %v519_v8 }
  0x62   : > { %v1026_v24 = vpop.eup %1025  ;;  %1031 = vrsqrt.f32 %v592_v2  ;;  %v567_v16 = vadd.f32 %v559_v0, %v551_v11  ;;  %v522_v10 = vadd.f32 1e-08, %v1424_v18  ;;  %v530_v3 = vadd.f32 1e-08, %v887_v13  ;;  %v889_v11 = vld [vmem:[%s1363_s29 + $0x138] sm:$0xff] }
  0x63   : > { %v1028_v55 = vpop.eup %1027  ;;  %v631_v26 = vsub.f32 %v1668_v35, %v1671_v40  ;;  %v575_v30 = vmax.f32 %v543_v36, 1e-30  ;;  %v1688_v15 = vadd.f32 %v655_v28, %v647_v37  ;;  %v521_v53 = vadd.f32 1e-08, %v1431_v20  ;;  %v897_v13 = vld [vmem:[%s1363_s29 + $0x178] sm:$0xff] }
  0x64   : > { %407 = vrot.lane.b32.xlu1 %v1582_v56, %s1232_s27  ;;  %v605_v61 = vmul.f32 %v1028_v55, %v1026_v24  ;;  %v591_v42 = vmax.f32 %v567_v16, 1e-30  ;;  %v538_v47 = vmul.f32 %v522_v10, %v522_v10  ;;  %v658_v1 = vmul.f32 %v895_v62, %v522_v10 }
  0x65   : > { %405 = vrot.lane.b32.xlu0 %v1557_v7, %s1232_s27  ;;  %1033 = vrsqrt.f32 %v575_v30  ;;  %v554_v18 = vmul.f32 %v530_v3, %v530_v3  ;;  %v1698_v51 = vmul.f32 %v530_v3, %v522_v10  ;;  %v650_v52 = vmul.f32 %v1427_v19, %v530_v3 }
  0x66   : > { %v1676_v4 = vmul.f32 %v629_v38, %v605_v61  ;;  %v1678_v41 = vmul.f32 %v661_v5, %v605_v61  ;;  %v562_v38 = vmul.f32 %v895_v62, %v895_v62  ;;  %v1691_v5 = vmul.f32 %v1427_v19, %v895_v62 }
  0x67   : > { %1035 = vrsqrt.f32 %v591_v42  ;;  %v546_v49 = vadd.f32 %v538_v47, %v1452_v27  ;;  %v537_v54 = vmul.f32 %v521_v53, %v521_v53  ;;  %v1706_v20 = vadd.f32 %v658_v1, %v650_v52 }
  0x68   : > { %411 = vrot.lane.b32.xlu1 %v1572_v48, %s1232_s27  ;;  %v570_v24 = vadd.f32 %v562_v38, %v554_v18  ;;  %v634_v46 = vsub.f32 %v1698_v51, %v1691_v5  ;;  %v529_v19 = vadd.f32 1e-08, %v886_v45  ;;  %v561_v55 = vmul.f32 %v894_v57, %v894_v57  ;;  %v888_v18 = vld [vmem:[%s1363_s29 + $0x130] sm:$0xff] }
  0x69   : > { %409 = vrot.lane.b32.xlu0 %v1547_v17, %s1232_s27  ;;  %v578_v8 = vmax.f32 %v546_v49, 1e-30  ;;  %v545_v25 = vadd.f32 %v537_v54, %v1458_v29  ;;  %v1714_v60 = vmul.f32 %v1434_v21, %v894_v57  ;;  %v657_v62 = vmul.f32 %v894_v57, %v521_v53 }
  0x6a   : > { %v594_v27 = vmax.f32 %v570_v24, 1e-30  ;;  %v553_v2 = vmul.f32 %v529_v19, %v529_v19  ;;  %v1716_v6 = vmul.f32 %v529_v19, %v521_v53  ;;  %v649_v29 = vmul.f32 %v1434_v21, %v529_v19 }
  0x6b   : > { %1037 = vrsqrt.f32 %v578_v8  ;;  %v577_v61 = vmax.f32 %v545_v25, 1e-30  ;;  %v1030_v0 = vpop.eup %1029  ;;  %v524_v36 = vadd.f32 1e-08, %v1438_v22  ;;  %v532_v38 = vadd.f32 1e-08, %v889_v11 }
  0x6c   : > { %415 = vrot.lane.b32.xlu1 %v1604_v63, %s1232_s27  ;;  %1039 = vrsqrt.f32 %v594_v27  ;;  %v569_v16 = vadd.f32 %v561_v55, %v553_v2  ;;  %v633_v37 = vsub.f32 %v1716_v6, %v1714_v60  ;;  %v665_v30 = vadd.f32 %v657_v62, %v649_v29  ;;  %v896_v27 = vld [vmem:[%s1363_s29 + $0x170] sm:$0xff] }
  0x6d   : > { %413 = vrot.lane.b32.xlu0 %v1613_v14, %s1232_s27  ;;  %v540_v10 = vmul.f32 %v524_v36, %v524_v36  ;;  %1041 = vrsqrt.f32 %v577_v61  ;;  %v564_v47 = vmul.f32 %v897_v13, %v897_v13  ;;  %v556_v21 = vmul.f32 %v532_v38, %v532_v38 }
  0x6e   : > { %v593_v3 = vmax.f32 %v569_v16, 1e-30  ;;  %v620_v53 = vmul.f32 %v532_v38, %v524_v36  ;;  %v628_v45 = vmul.f32 %v1441_v23, %v897_v13  ;;  %v660_v24 = vmul.f32 %v897_v13, %v524_v36 }
  0x6f   : > { %v1032_v28 = vpop.eup %1031  ;;  %v548_v1 = vadd.f32 %v540_v10, %v1464_v31  ;;  %v572_v57 = vadd.f32 %v564_v47, %v556_v21  ;;  %v652_v31 = vmul.f32 %v1441_v23, %v532_v38  ;;  %v523_v19 = vadd.f32 1e-08, %v1468_v32 }
  0x70   : > { %419 = vrot.lane.b32.xlu1 %v1623_v43, %s1232_s27  ;;  %v608_v42 = vmul.f32 %v1032_v28, %v1030_v0  ;;  %1043 = vrsqrt.f32 %v593_v3  ;;  %v636_v25 = vsub.f32 %v620_v53, %v628_v45  ;;  %v531_v44 = vadd.f32 1e-08, %v888_v18 }
  0x71   : > { %417 = vrot.lane.b32.xlu0 %v1643_v34, %s1232_s27  ;;  %v580_v54 = vmax.f32 %v548_v1, 1e-30  ;;  %v539_v55 = vmul.f32 %v523_v19, %v523_v19  ;;  %v563_v2 = vmul.f32 %v896_v27, %v896_v27  ;;  %v627_v11 = vmul.f32 %v1471_v33, %v896_v27 }
  0x72   : > { %v1729_v22 = vmul.f32 %v632_v58, %v608_v42  ;;  %v1732_v52 = vmul.f32 %v1666_v50, %v608_v42  ;;  %v1034_v49 = vpop.eup %1033  ;;  %v596_v58 = vmax.f32 %v572_v57, 1e-30  ;;  %v668_v50 = vadd.f32 %v660_v24, %v652_v31  ;;  %v877_v57 = vld [vmem:[%s1363_s29 + $0xd8] sm:$0xff]  ;;  %v876_v31 = vld [vmem:[%s1363_s29 + $0xd0] sm:$0xff] }
  0x73   : > { %1045 = vrsqrt.f32 %v580_v54  ;;  %v555_v60 = vmul.f32 %v531_v44, %v531_v44  ;;  %v547_v32 = vadd.f32 %v539_v55, %v1488_v39  ;;  %v619_v6 = vmul.f32 %v531_v44, %v523_v19 }
  0x74   : > { %v1036_v8 = vpop.eup %1035  ;;  %1047 = vrsqrt.f32 %v596_v58  ;;  %v651_v62 = vmul.f32 %v1471_v33, %v531_v44  ;;  %v659_v36 = vmul.f32 %v896_v27, %v523_v19  ;;  %v909_v24 = vmul.f32 -1.442695, %v877_v57  ;;  %v878_v19 = vld [vmem:[%s1363_s29 + $0xe0] sm:$0xff]  ;;  %v881_v44 = vld [vmem:[%s1363_s29 + $0xf8] sm:$0xff]  ;;  %v880_v58 = vld [vmem:[%s1363_s29 + $0xf0] sm:$0xff] }
  0x75   : > { %v607_v12 = vmul.f32 %v1036_v8, %v1034_v49  ;;  %v571_v29 = vadd.f32 %v563_v2, %v555_v60  ;;  %v579_v16 = vmax.f32 %v547_v32, 1e-30  ;;  %v635_v35 = vsub.f32 %v619_v6, %v627_v11  ;;  %v874_v49 = vld [vmem:[%s1363_s29 + $0xc0] sm:$0xff]  ;;  %v879_v8 = vld [vmem:[%s1363_s29 + $0xe8] sm:$0xff] }
  0x76   : > { %v667_v28 = vadd.f32 %v659_v36, %v651_v62  ;;  %v906_v54 = vmul.f32 -1.442695, %v874_v49  ;;  %v911_v27 = vmul.f32 -1.442695, %v879_v8  ;;  %v912_v55 = vmul.f32 -1.442695, %v880_v58 }
  0x77   : > { %v1741_v61 = vmul.f32 %v631_v26, %v607_v12  ;;  %v1744_v23 = vmul.f32 %v1688_v15, %v607_v12  ;;  %v595_v26 = vmax.f32 %v571_v29, 1e-30  ;;  %1049 = vrsqrt.f32 %v579_v16  ;;  %v858_v49 = vld [vmem:[%s1363_s29 + $0x40] sm:$0xff]  ;;  %v230_v58 = vld [vmem:[%s1363_s29 + $0x18] sm:$0xff] }
  0x78   : > { %v1038_v0 = vpop.eup %1037  ;;  %v910_v12 = vmul.f32 -1.442695, %v878_v19  ;;  %v377_v6 = vlaneseq }
  0x79   : > { %v1040_v13 = vpop.eup %1039  ;;  %1051 = vrsqrt.f32 %v595_v26 }
  0x7a   : > { %v610_v40 = vmul.f32 %v1040_v13, %v1038_v0  ;;  %v1042_v15 = vpop.eup %1041  ;;  %v1777_v16 = vand.u32 127, %v377_v6  ;;  %v867_v6 = vld [vmem:[%s1363_s29 + $0x88] sm:$0xff] }
  0x7c   : > { %v1752_v39 = vmul.f32 %v634_v46, %v610_v40  ;;  %v1755_v10 = vmul.f32 %v1706_v20, %v610_v40  ;;  %vm379_vm0 = vcmp.ge.s32.totalorder %v1777_v16, 1  ;;  %vm404_vm1 = vcmp.le.s32.totalorder %v1777_v16, 126 }
  0x7d   : > { %v1044_v33 = vpop.eup %1043 }
  0x7e   : > { %v609_v38 = vmul.f32 %v1044_v33, %v1042_v15 }
  0x80   : > { %v1046_v42 = vpop.eup %1045  ;;  %v1757_v3 = vmul.f32 %v633_v37, %v609_v38  ;;  %v1759_v47 = vmul.f32 %v665_v30, %v609_v38  ;;  %v875_v37 = vld [vmem:[%s1363_s29 + $0xc8] sm:$0xff] }
  0x81   : > { %v1048_v1 = vpop.eup %1047  ;;  %v907_v30 = vmul.f32 -1.442695, %v875_v37 }
  0x82   : > { %v612_v21 = vmul.f32 %v1048_v1, %v1046_v42 }
  0x83   : > { %1053 = vpow2.f32 %v907_v30  ;;  %v227_v30 = vld [vmem:[%s1363_s29] sm:$0xff] }
  0x84   : > { %v1761_v5 = vmul.f32 %v636_v25, %v612_v21  ;;  %v1763_v51 = vmul.f32 %v668_v50, %v612_v21  ;;  %v1050_v46 = vpop.eup %1049  ;;  %1055 = vpow2.f32 %v906_v54  ;;  %v908_v25 = vmul.f32 -1.442695, %v876_v31  ;;  %v859_v21 = vld [vmem:[%s1363_s29 + $0x48] sm:$0xff]  ;;  %v860_v31 = vld [vmem:[%s1363_s29 + $0x50] sm:$0xff] }
  0x85   : > { %1057 = vpow2.f32 %v909_v24  ;;  %v913_v50 = vmul.f32 -1.442695, %v881_v44  ;;  %v861_v24 = vld [vmem:[%s1363_s29 + $0x58] sm:$0xff]  ;;  %v438_v8 = vmul.f32 %v859_v21, %v1582_v56  ;;  %v229_v44 = vld [vmem:[%s1363_s29 + $0x10] sm:$0xff] }
  0x86   : > { %v1052_v20 = vpop.eup %1051  ;;  %1059 = vpow2.f32 %v908_v25  ;;  %v863_v25 = vld [vmem:[%s1363_s29 + $0x68] sm:$0xff] }
  0x87   : > { %v611_v53 = vmul.f32 %v1052_v20, %v1050_v46  ;;  %1061 = vpow2.f32 %v911_v27  ;;  %v228_v20 = vld [vmem:[%s1363_s29 + $0x8] sm:$0xff] }
  0x88   : > { %1063 = vpow2.f32 %v910_v12 }
  0x89   : > { %v1765_v18 = vmul.f32 %v635_v35, %v611_v53  ;;  %v1767_v45 = vmul.f32 %v667_v28, %v611_v53  ;;  %1065 = vpow2.f32 %v913_v50 }
  0x8a   : > { %1067 = vpow2.f32 %v912_v55 }
  0x90   : > { %v1054_v60 = vpop.eup %1053 }
  0x91   : > { %v1056_v2 = vpop.eup %1055  ;;  %v494_v0 = vadd.f32 1.0, %v1054_v60  ;;  %v437_v60 = vmul.f32 %v858_v49, %v1557_v7 }
  0x92   : > { %v1058_v29 = vpop.eup %1057  ;;  %v493_v62 = vadd.f32 1.0, %v1056_v2 }
  0x93   : > { %v1060_v36 = vpop.eup %1059  ;;  %1069 = vrcp.f32 %v494_v0  ;;  %v496_v26 = vadd.f32 1.0, %v1058_v29  ;;  %v440_v0 = vmul.f32 %v861_v24, %v1572_v48  ;;  %v232_v29 = vld [vmem:[%s1363_s29 + $0x28] sm:$0xff] }
  0x94   : > { %v1062_v40 = vpop.eup %1061  ;;  %1071 = vrcp.f32 %v493_v62  ;;  %v495_v28 = vadd.f32 1.0, %v1060_v36 }
  0x95   : > { %v1064_v15 = vpop.eup %1063  ;;  %v498_v42 = vadd.f32 1.0, %v1062_v40  ;;  %1073 = vrcp.f32 %v496_v26  ;;  %v865_v40 = vld [vmem:[%s1363_s29 + $0x78] sm:$0xff]  ;;  %v864_v26 = vld [vmem:[%s1363_s29 + $0x70] sm:$0xff] }
  0x96   : > { %v1066_v1 = vpop.eup %1065  ;;  %1075 = vrcp.f32 %v495_v28  ;;  %v497_v37 = vadd.f32 1.0, %v1064_v15 }
  0x97   : > { %v1068_v46 = vpop.eup %1067  ;;  %1077 = vrcp.f32 %v498_v42  ;;  %v500_v27 = vadd.f32 1.0, %v1066_v1 }
  0x98   : > { %v499_v55 = vadd.f32 1.0, %v1068_v46  ;;  %1079 = vrcp.f32 %v497_v37  ;;  %v231_v46 = vld [vmem:[%s1363_s29 + $0x20] sm:$0xff]  ;;  %v869_v37 = vld [vmem:[%s1363_s29 + $0x98] sm:$0xff] }
  0x99   : > { %1081 = vrcp.f32 %v500_v27 }
  0x9a   : > { %1083 = vrcp.f32 %v499_v55 }
  0xa0   : > { %v1070_v42 = vpop.eup %1069 }
  0xa1   : > { %v1072_v49 = vpop.eup %1071 }
  0xc6   : > { %v385_v32 = vpop.permute.xlu1 %384 }
  0xc7   : > { %v381_v11 = vpop.permute.xlu0 %380  ;;  %v398_v12 = vsel %vm379_vm0, %v385_v32, 0.0  ;;  %v442_v32 = vmul.f32 %v863_v25, %v1604_v63  ;;  %v868_v25 = vld [vmem:[%s1363_s29 + $0x90] sm:$0xff] }
  0xc8   : > { %v396_v54 = vsel %vm379_vm0, %v381_v11, 0.0  ;;  %v439_v11 = vmul.f32 %v860_v31, %v1547_v17  ;;  %v431_v7 = vmul.f32 %v398_v12, %v229_v44  ;;  %v1826_v31 = vmul.f32 %v864_v26, %v1643_v34  ;;  %v1074_v34 = vpop.eup %1073  ;;  %v870_v26 = vld [vmem:[%s1363_s29 + $0xa0] sm:$0xff] }
  0xc9   : > { %v429_v2 = vmul.f32 %v396_v54, %v227_v30  ;;  %v444_v54 = vmul.f32 %v865_v40, %v1623_v43 }
  0xca   : > { %v387_v13 = vpop.permute.xlu1 %386  ;;  %v447_v27 = vadd.f32 %v439_v11, %v431_v7 }
  0xcb   : > { %v383_v35 = vpop.permute.xlu0 %382  ;;  %v399_v50 = vsel %vm379_vm0, %v387_v13, 0.0  ;;  %v866_v13 = vld [vmem:[%s1363_s29 + $0x80] sm:$0xff]  ;;  %v445_v1 = vadd.f32 %v437_v60, %v429_v2  ;;  %v234_v60 = vld [vmem:[%s1363_s29 + $0x38] sm:$0xff] }
  0xcc   : > { %v397_v53 = vsel %vm379_vm0, %v383_v35, 0.0  ;;  %v862_v35 = vld [vmem:[%s1363_s29 + $0x60] sm:$0xff]  ;;  %v432_v28 = vmul.f32 %v399_v50, %v230_v58 }
  0xcd   : > { %v430_v56 = vmul.f32 %v397_v53, %v228_v20  ;;  %v441_v30 = vmul.f32 %v862_v35, %v1613_v14 }
  0xce   : > { %v391_v33 = vpop.permute.xlu1 %390  ;;  %v448_v44 = vadd.f32 %v440_v0, %v432_v28  ;;  %v871_v0 = vld [vmem:[%s1363_s29 + $0xa8] sm:$0xff] }
  0xcf   : > { %v389_v38 = vpop.permute.xlu0 %388  ;;  %v401_v62 = vsel %vm379_vm0, %v391_v33, 0.0  ;;  %v446_v48 = vadd.f32 %v438_v8, %v430_v56 }
  0xd0   : > { %v434_v21 = vmul.f32 %v401_v62, %v232_v29  ;;  %v400_v20 = vsel %vm379_vm0, %v389_v38, 0.0  ;;  %v1076_v29 = vpop.eup %1075  ;;  %v233_v62 = vld [vmem:[%s1363_s29 + $0x30] sm:$0xff] }
  0xd1   : > { %v433_v50 = vmul.f32 %v400_v20, %v231_v46 }
  0xd2   : > { %v1788_v57 = vpop.permute.xlu1 %394  ;;  %v450_v55 = vadd.f32 %v442_v32, %v434_v21 }
  0xd3   : > { %v1794_v19 = vpop.permute.xlu0 %392  ;;  %v403_v2 = vsel %vm379_vm0, %v1788_v57, 0.0 }
  0xd6   : > { %v408_v36 = vpop.permute.xlu1 %407 }
  0xd7   : > { %v422_v17 = vsel %vm404_vm1, %v408_v36, 0.0  ;;  %v406_v15 = vpop.permute.xlu0 %405  ;;  %v402_v36 = vsel %vm379_vm0, %v1794_v19, 0.0 }
  0xd8   : > { %v454_v63 = vmul.f32 %v867_v6, %v422_v17  ;;  %v421_v33 = vsel %vm404_vm1, %v406_v15, 0.0  ;;  %v435_v19 = vmul.f32 %v402_v36, %v233_v62 }
  0xd9   : > { %v453_v53 = vmul.f32 %v866_v13, %v421_v33 }
  0xda   : > { %v462_v24 = vadd.f32 %v454_v63, %v446_v48  ;;  %v412_v8 = vpop.permute.xlu1 %411  ;;  %v1078_v48 = vpop.eup %1077  ;;  %v436_v63 = vmul.f32 %v403_v2, %v234_v60 }
  0xdb   : > { %v461_v12 = vadd.f32 %v453_v53, %v445_v1  ;;  %v424_v38 = vsel %vm404_vm1, %v412_v8, 0.0  ;;  %v410_v58 = vpop.permute.xlu0 %409  ;;  %v873_v1 = vld [vmem:[%s1363_s29 + $0xb8] sm:$0xff]  ;;  %v1080_v21 = vpop.eup %1079 }
  0xdc   : > { %v678_v14 = vmul.f32 %v1070_v42, %v462_v24  ;;  %v456_v56 = vmul.f32 %v869_v37, %v424_v38  ;;  %v423_v43 = vsel %vm404_vm1, %v410_v58, 0.0 }
  0xdd   : > { %v677_v6 = vmul.f32 %v1072_v49, %v461_v12  ;;  %v455_v11 = vmul.f32 %v868_v25, %v423_v43  ;;  %v872_v49 = vld [vmem:[%s1363_s29 + $0xb0] sm:$0xff]  ;;  %v452_v12 = vadd.f32 %v444_v54, %v436_v63 }
  0xde   : > { %v686_v13 = vmul.f32 %v678_v14, %v1662_v59  ;;  %v702_v35 = vmul.f32 %v678_v14, %v1664_v9  ;;  %v464_v32 = vadd.f32 %v456_v56, %v448_v44  ;;  %v416_v40 = vpop.permute.xlu1 %415  ;;  %v1082_v44 = vpop.eup %1081 }
  0xdf   : > { %v685_v7 = vmul.f32 %v677_v6, %v1676_v4  ;;  %v701_v57 = vmul.f32 %v677_v6, %v1678_v41  ;;  %v463_v28 = vadd.f32 %v455_v11, %v447_v27  ;;  %v426_v17 = vsel %vm404_vm1, %v416_v40, 0.0  ;;  %v414_v15 = vpop.permute.xlu0 %413 }
  0xe0   : > { %694 = vst [vmem:[%s1851_s30 + $0x8] sm:$0xff] %v686_v13  ;;  %915 = vst [vmem:[%s1851_s30 + $0x48] sm:$0xff] %v702_v35  ;;  %v680_v59 = vmul.f32 %v1074_v34, %v464_v32  ;;  %v458_v9 = vmul.f32 %v871_v0, %v426_v17  ;;  %v425_v4 = vsel %vm404_vm1, %v414_v15, 0.0  ;;  %v449_v41 = vadd.f32 %v441_v30, %v433_v50 }
  0xe1   : > { %693 = vst [vmem:[%s1851_s30] sm:$0xff] %v685_v7  ;;  %914 = vst [vmem:[%s1851_s30 + $0x40] sm:$0xff] %v701_v57  ;;  %v679_v33 = vmul.f32 %v1076_v29, %v463_v28  ;;  %v457_v42 = vmul.f32 %v870_v26, %v425_v4 }
  0xe2   : > { %v688_v46 = vmul.f32 %v680_v59, %v1729_v22  ;;  %v704_v20 = vmul.f32 %v680_v59, %v1732_v52  ;;  %v466_v53 = vadd.f32 %v458_v9, %v450_v55  ;;  %v420_v37 = vpop.permute.xlu1 %419 }
  0xe3   : > { %v687_v30 = vmul.f32 %v679_v33, %v1741_v61  ;;  %v703_v24 = vmul.f32 %v679_v33, %v1744_v23  ;;  %v465_v8 = vadd.f32 %v457_v42, %v449_v41  ;;  %v428_v25 = vsel %vm404_vm1, %v420_v37, 0.0  ;;  %v418_v27 = vpop.permute.xlu0 %417  ;;  %v1084_v61 = vpop.eup %1083 }
  0xe4   : > { %696 = vst [vmem:[%s1851_s30 + $0x18] sm:$0xff] %v688_v46  ;;  %917 = vst [vmem:[%s1851_s30 + $0x58] sm:$0xff] %v704_v20  ;;  %v682_v22 = vmul.f32 %v1078_v48, %v466_v53  ;;  %v460_v52 = vmul.f32 %v873_v1, %v428_v25  ;;  %v427_v38 = vsel %vm404_vm1, %v418_v27, 0.0  ;;  %v451_v23 = vadd.f32 %v1826_v31, %v435_v19 }
  0xe5   : > { %695 = vst [vmem:[%s1851_s30 + $0x10] sm:$0xff] %v687_v30  ;;  %916 = vst [vmem:[%s1851_s30 + $0x50] sm:$0xff] %v703_v24  ;;  %v681_v58 = vmul.f32 %v1080_v21, %v465_v8  ;;  %v459_v54 = vmul.f32 %v872_v49, %v427_v38 }
  0xe6   : > { %v690_v50 = vmul.f32 %v682_v22, %v1752_v39  ;;  %v706_v14 = vmul.f32 %v682_v22, %v1755_v10  ;;  %v468_v56 = vadd.f32 %v460_v52, %v452_v12 }
  0xe7   : > { %v689_v43 = vmul.f32 %v681_v58, %v1757_v3  ;;  %v705_v16 = vmul.f32 %v681_v58, %v1759_v47  ;;  %v467_v34 = vadd.f32 %v459_v54, %v451_v23 }
  0xe8   : > { %698 = vst [vmem:[%s1851_s30 + $0x28] sm:$0xff] %v690_v50  ;;  %919 = vst [vmem:[%s1851_s30 + $0x68] sm:$0xff] %v706_v14  ;;  %v684_v31 = vmul.f32 %v1082_v44, %v468_v56 }
  0xe9   : > { %697 = vst [vmem:[%s1851_s30 + $0x20] sm:$0xff] %v689_v43  ;;  %918 = vst [vmem:[%s1851_s30 + $0x60] sm:$0xff] %v705_v16  ;;  %v683_v39 = vmul.f32 %v1084_v61, %v467_v34 }
  0xea   : > { %v692_v10 = vmul.f32 %v684_v31, %v1761_v5  ;;  %v708_v3 = vmul.f32 %v684_v31, %v1763_v51 }
  0xeb   : > { %v691_v47 = vmul.f32 %v683_v39, %v1765_v18  ;;  %v707_v55 = vmul.f32 %v683_v39, %v1767_v45 }
  0xec   : > { %700 = vst [vmem:[%s1851_s30 + $0x38] sm:$0xff] %v692_v10  ;;  %921 = vst [vmem:[%s1851_s30 + $0x78] sm:$0xff] %v708_v3 }
  0xed   : > { %699 = vst [vmem:[%s1851_s30 + $0x30] sm:$0xff] %v691_v47  ;;  %920 = vst [vmem:[%s1851_s30 + $0x70] sm:$0xff] %v707_v55 }
  0xee   : > { %1154 = shalt.err (!%p1151_p7)
}
  0xef   : > { %s1155_s26 = scalar_lea.hbm %s1889_s16, 2048  ;;  %s1159_s18 = scalar_lea.hbm %s1947_s2, 4096 }
  0xf0   : > { %p1156_p1 = scmp.ne.s32.totalorder %s1889_s16, %s1155_s26  ;;  %p1160_p3 = scmp.lt.s32.totalorder %s1889_s16, %s1947_s2 }
  0xf1   : > { %p1161_p8 = scmp.lt.s32.totalorder %s1159_s18, %s1155_s26 }
  0xf2   : > { %p1157_p10 = pnand %p1156_p1, %p1302_p9 }
  0xf3   : > { %p1162_p0 = por %p1161_p8, %p1160_p3 }
  0xf4   : > { %p1158_p13 = pneg %p1157_p10 }
  0xf6   : > { %p1163_p2 = pnand %p1162_p0, %p1158_p13 }
  0xf8   : > { %1166 = shalt.err (!%p1163_p2)
}
  0xf9   : > { %s1234_s27 = smov 128   ;;  %s1235_s30 = smov 8  }
  0xfa   : > { %936 = dma.vmem_to_hbm [thread:$0]  (%p1302_p9), %s1891_s7, 2048, %s1889_s16, %s719_s12, %s1234_s27, %s1234_s27, %s1235_s30  }
  0xfb PF: > { %s749_s4 = sand.u32 1, %s1205_s9   ;;  %p946_p4 = pnand %p850_p12, %p1309_p11 }
  0xfc   : > { %s750_s8 = scalar_lea.sflag [#allocation4], %s749_s4 }
  0xfd   : > { %p947_p5 = pneg %p946_p4 }
  0xff   : > { %1200 = dma.done.wait (%p947_p5), %s750_s8, 2048  }
 0x100   : > { %1202 = vsyncadd (%p947_p5), %s750_s8, 4294965248  ;;  %s21_s14 = sadd.s32 1, %s1225_s14   ;;  %s1954_s9 = smov %s1209_s10 }
 0x101   : > { %p18_p6 = scmp.ge.s32.totalorder %s21_s14, 4   ;;  %s1955_s10 = smov %s1213_s11 }
 0x102   : > { %s1956_s11 = smov %s1307_s23  ;;  %s1957_s12 = smov %s1221_s13 }
 0x103   : > { %s1958_s13 = smov %s1960_s17  ;;  %20 = sbr.rel (!%p18_p6) target bundleno = 8 (0x8), region = 93 }
 0x108   :  { %755 = vsyncpa [#allocation3], 1 }
 0x109   :  { %757 = vsyncpa [#allocation3 + $0x1], 1 }
 0x10a   :  { %758 = vsyncpa [#allocation6], 1 }
 0x10b   :  { %760 = vsyncpa [#allocation6 + $0x1], 1 }
 0x10c   :  { %761 = vsyncpa [#allocation4], 1 }
 0x10d   :  { %763 = vsyncpa [#allocation4 + $0x1], 1 }

</bundles_post_ra>
